<compile_context>
chip_gen: v7x
topology: tpu7x:2x2x1
jax: 0.10.0
libtpu: 0.0.40
codegen_flags: <defaults>
</compile_context>

<pallas_src>
import functools

import jax
import jax.numpy as jnp
from jax.experimental import pallas as pl
from jax.experimental.pallas import tpu as pltpu


# ---------------------------------------------------------------- helpers ----

def _pick_tile(n, max_tile):
    """Largest power-of-two tile (>= 8) dividing n, else the full extent."""
    t = max_tile
    while t >= 8:
        if n % t == 0:
            return t
        t //= 2
    return n


def _vmem_limit_bytes():
    """Scoped-VMEM budget ~= half of physical (96 MiB cap); 32 MiB fallback.

    v5e/v6e (128 MiB physical) -> 64 MiB; v7x (64 MiB per core) -> 32 MiB.
    """
    try:
        cap = int(pltpu.get_tpu_info().vmem_capacity_bytes)
        return int(min(96 * 1024 * 1024, cap // 2))
    except Exception:
        return 32 * 1024 * 1024


# ---------------------------------------------------------------- kernels ----

def qkv_kernel(x_ref, w_ref, b_ref, q_ref, k_ref, v_ref):
    """Fused Q/K/V projection.

    x: (TILE_M, D) f32, w: (D, 3D) bf16 resident, b: (1, 3D) f32 resident.
    One MXU pass over x per row tile (bf16 operands, f32 accumulation), three
    separate (TILE_M, D) stores so no packed-buffer slicing happens in HBM.
    """
    d = q_ref.shape[-1]
    acc = jnp.dot(x_ref[...].astype(w_ref.dtype), w_ref[...],
                  preferred_element_type=jnp.float32)
    acc = acc + b_ref[...]
    q_ref[...] = acc[:, :d].astype(q_ref.dtype)
    k_ref[...] = acc[:, d:2 * d].astype(k_ref.dtype)
    v_ref[...] = acc[:, 2 * d:].astype(v_ref.dtype)


def flash_attn_kernel(q_ref, k_ref, v_ref, o_ref, m_sc, l_sc, acc_sc, *, scale):
    """Flash-style attention for one (batch, q-tile) pair over KV tiles.

    Blocks are (1, H, tq, dh) / (1, H, tkv, dh); all heads go through one
    batched dot_general per step.  Online softmax keeps only the (H, tq, tkv)
    score tile live; m / l / acc scratch is f32 and persists across the
    innermost ("arbitrary") KV grid axis.
    """
    ki = pl.program_id(2)

    @pl.when(ki == 0)
    def _():
        m_sc[...] = jnp.full(m_sc.shape, -jnp.inf, dtype=m_sc.dtype)
        l_sc[...] = jnp.zeros(l_sc.shape, dtype=l_sc.dtype)
        acc_sc[...] = jnp.zeros(acc_sc.shape, dtype=acc_sc.dtype)

    # Fold the softmax scale into q: (H,tq,dh)-sized multiply, not (H,tq,tkv).
    q = (q_ref[0].astype(jnp.float32) * scale).astype(k_ref.dtype)
    k = k_ref[0]
    v = v_ref[0]

    # Q @ K^T with the contraction on the last axis of both (no explicit k.T).
    # TODO(synk): inspect pl.lower_as_mlir for a per-head vxpose here; if one
    # shows up, store K pre-transposed from the QKV kernel instead.
    s = jax.lax.dot_general(
        q, k,
        dimension_numbers=(((2,), (2,)), ((0,), (0,))),
        preferred_element_type=jnp.float32)                    # (H, tq, tkv)

    m_prev = m_sc[...]
    m_new = jnp.maximum(m_prev, jnp.max(s, axis=-1, keepdims=True))
    alpha = jnp.exp(m_prev - m_new)                            # (H, tq, 1)
    p = jnp.exp(s - m_new)                                     # f32 probs tile
    l_sc[...] = alpha * l_sc[...] + jnp.sum(p, axis=-1, keepdims=True)
    acc_sc[...] = alpha * acc_sc[...] + jax.lax.dot_general(
        p.astype(v.dtype), v,
        dimension_numbers=(((2,), (1,)), ((0,), (0,))),
        preferred_element_type=jnp.float32)                    # (H, tq, dh)
    m_sc[...] = m_new

    @pl.when(ki == pl.num_programs(2) - 1)
    def _():
        # Exact 1/l normalization, deferred to the small (H, tq, dh) context.
        o_ref[0] = (acc_sc[...] / l_sc[...]).astype(o_ref.dtype)
        # TODO(synk): for dh < 128 this store is lane-masked; a lane-dense
        # (tq, D) staging layout would remove the vst.msk partial stores.


def out_ln_kernel(ctx_ref, xres_ref, wo_ref, bo_ref, g_ref, b_ref, o_ref, *, eps):
    """Output projection + residual + LayerNorm (Dropout p=0.0 is identity).

    ctx/wo are bf16 MXU operands with f32 accumulation; residual add and the
    LayerNorm statistics are computed in f32.
    """
    out = jnp.dot(ctx_ref[...], wo_ref[...], preferred_element_type=jnp.float32)
    out = out + bo_ref[...] + xres_ref[...].astype(jnp.float32)
    mean = jnp.mean(out, axis=-1, keepdims=True)
    var = jnp.mean(jnp.square(out - mean), axis=-1, keepdims=True)
    normed = (out - mean) * jax.lax.rsqrt(var + eps)
    o_ref[...] = (normed * g_ref[...] + b_ref[...]).astype(o_ref.dtype)


# ---------------------------------------------------------------- wrapper ----

@functools.partial(jax.jit, static_argnums=(2,))
def multi_head_attention(x, params, num_head):
    B, S, D = x.shape
    dh = D // num_head
    M = B * S
    x2d = x.reshape(M, D)

    vmem_limit = _vmem_limit_bytes()

    def cparams(dims):
        return pltpu.CompilerParams(dimension_semantics=dims,
                                    vmem_limit_bytes=vmem_limit)

    # ---- fused, packed QKV projection (bf16 weights, f32 accumulate) --------
    wqkv = jnp.concatenate(
        [params["wq_t"], params["wk_t"], params["wv_t"]], axis=1
    ).astype(jnp.bfloat16)                                      # (D, 3D) bf16
    bqkv = jnp.concatenate(
        [params["bq"], params["bk"], params["bv"]], axis=1)     # (1, 3D) f32

    tile_m = _pick_tile(M, max_tile=1024)
    # Keep >= 2 row tiles when possible so both v7x TensorCores get work.
    if (M // tile_m < 2 and tile_m >= 16 and tile_m % 2 == 0
            and M % (tile_m // 2) == 0):
        tile_m //= 2
    grid_m = M // tile_m

    row = lambda i: (i, 0)
    const = lambda i: (0, 0)

    qkv_cost = pl.CostEstimate(
        flops=2 * M * D * 3 * D,
        transcendentals=0,
        bytes_accessed=4 * M * D + 2 * D * 3 * D + 4 * 3 * D + 2 * M * 3 * D)

    q2d, k2d, v2d = pl.pallas_call(
        qkv_kernel,
        out_shape=(jax.ShapeDtypeStruct((M, D), jnp.bfloat16),) * 3,
        grid=(grid_m,),
        in_specs=[
            pl.BlockSpec((tile_m, D), row),
            pl.BlockSpec((D, 3 * D), const),    # packed bf16 weight, resident
            pl.BlockSpec((1, 3 * D), const),    # packed f32 bias, resident
        ],
        out_specs=(pl.BlockSpec((tile_m, D), row),) * 3,
        compiler_params=cparams(("parallel",)),
        cost_estimate=qkv_cost,
    )(x2d, wqkv, bqkv)

    # ---- exact replication of torch's raw .view(B*H, S, dh) head split -----
    q4 = q2d.reshape(B, num_head, S, dh)
    k4 = k2d.reshape(B, num_head, S, dh)
    v4 = v2d.reshape(B, num_head, S, dh)

    # ---- flash-style KV-tiled attention, all heads batched per step --------
    scale = float(dh) ** (-0.5)
    tq = _pick_tile(S, max_tile=256)
    tkv = _pick_tile(S, max_tile=256)
    n_q, n_kv = S // tq, S // tkv

    q_spec = pl.BlockSpec((1, num_head, tq, dh), lambda b, qi, ki: (b, 0, qi, 0))
    kv_spec = pl.BlockSpec((1, num_head, tkv, dh), lambda b, qi, ki: (b, 0, ki, 0))
    o_spec = pl.BlockSpec((1, num_head, tq, dh), lambda b, qi, ki: (b, 0, qi, 0))

    attn_cost = pl.CostEstimate(
        flops=4 * B * num_head * S * S * dh + 6 * B * num_head * S * S,
        transcendentals=B * num_head * S * S,
        bytes_accessed=2 * B * S * D * (2 * n_q + 2))

    ctx = pl.pallas_call(
        functools.partial(flash_attn_kernel, scale=scale),
        out_shape=jax.ShapeDtypeStruct((B, num_head, S, dh), jnp.bfloat16),
        grid=(B, n_q, n_kv),
        in_specs=[q_spec, kv_spec, kv_spec],
        out_specs=o_spec,
        scratch_shapes=[
            pltpu.VMEM((num_head, tq, 1), jnp.float32),    # running max m
            pltpu.VMEM((num_head, tq, 1), jnp.float32),    # running sum l
            pltpu.VMEM((num_head, tq, dh), jnp.float32),   # context accumulator
        ],
        compiler_params=cparams(("parallel", "parallel", "arbitrary")),
        cost_estimate=attn_cost,
    )(q4, k4, v4)

    # ---- torch: context.view(B, -1, dh*H) -> proj + residual + LayerNorm ----
    ctx2d = ctx.reshape(M, D)
    wo_bf16 = params["wo_t"].astype(jnp.bfloat16)

    out_cost = pl.CostEstimate(
        flops=2 * M * D * D + 10 * M * D,
        transcendentals=M,
        bytes_accessed=2 * M * D + 4 * M * D + 2 * D * D + 4 * 3 * D + 4 * M * D)

    out = pl.pallas_call(
        functools.partial(out_ln_kernel, eps=1e-5),
        out_shape=jax.ShapeDtypeStruct((M, D), x.dtype),
        grid=(grid_m,),
        in_specs=[
            pl.BlockSpec((tile_m, D), row),    # bf16 context rows
            pl.BlockSpec((tile_m, D), row),    # f32 residual rows
            pl.BlockSpec((D, D), const),       # bf16 Wo, resident
            pl.BlockSpec((1, D), const),       # bo
            pl.BlockSpec((1, D), const),       # gamma
            pl.BlockSpec((1, D), const),       # beta
        ],
        out_specs=pl.BlockSpec((tile_m, D), row),
        compiler_params=cparams(("parallel",)),
        cost_estimate=out_cost,
    )(ctx2d, x2d, wo_bf16, params["bo"], params["gamma"], params["beta"])

    return out.reshape(B, S, D)


# -------------------------------------------------------------- reference ----

def ref_multi_head_attention(x, params, num_head):
    B, S, D = x.shape
    dh = D // num_head
    q = x.reshape(B * S, D) @ params["wq_t"] + params["bq"][0]
    k = x.reshape(B * S, D) @ params["wk_t"] + params["bk"][0]
    v = x.reshape(B * S, D) @ params["wv_t"] + params["bv"][0]
    q = q.reshape(B * num_head, S, dh)
    k = k.reshape(B * num_head, S, dh)
    v = v.reshape(B * num_head, S, dh)
    s = jnp.einsum("bij,bkj->bik", q, k) * (dh ** -0.5)
    p = jax.nn.softmax(s, axis=-1)
    ctx = jnp.einsum("bik,bkd->bid", p, v).reshape(B, S, D)
    out = ctx @ params["wo_t"] + params["bo"][0] + x
    mean = out.mean(-1, keepdims=True)
    var = ((out - mean) ** 2).mean(-1, keepdims=True)
    out = (out - mean) / jnp.sqrt(var + 1e-5)
    return out * params["gamma"][0] + params["beta"][0]


# ------------------------------------------------------------------- main ----

if __name__ == "__main__":
    B, S, dim_model, num_head = 2, 8, 32, 4

    key = jax.random.PRNGKey(0)
    keys = jax.random.split(key, 9)
    bound = 1.0 / (dim_model ** 0.5)   # PyTorch Linear default init range

    def uni(k, shape):
        return jax.random.uniform(k, shape, jnp.float32, -bound, bound)

    params = {
        # weights stored transposed: (D_in, D_out)
        "wq_t": uni(keys[0], (dim_model, dim_model)),
        "wk_t": uni(keys[1], (dim_model, dim_model)),
        "wv_t": uni(keys[2], (dim_model, dim_model)),
        "wo_t": uni(keys[3], (dim_model, dim_model)),
        "bq": uni(keys[4], (1, dim_model)),
        "bk": uni(keys[5], (1, dim_model)),
        "bv": uni(keys[6], (1, dim_model)),
        "bo": uni(keys[7], (1, dim_model)),
        # LayerNorm default init
        "gamma": jnp.ones((1, dim_model), jnp.float32),
        "beta": jnp.zeros((1, dim_model), jnp.float32),
    }

    x = jax.random.normal(keys[8], (B, S, dim_model), jnp.float32)

    out = jax.block_until_ready(multi_head_attention(x, params, num_head))
    ref = ref_multi_head_attention(x, params, num_head)

    assert out.shape == (B, S, dim_model)
    # Tolerance accounts for feeding the MXU bf16 operands (f32 accumulation,
    # f32 softmax/LayerNorm statistics); semantic errors would be O(1).
    assert jnp.allclose(out, ref, atol=2e-2, rtol=2e-2), "mismatch vs reference"
    print("KERNEL_OK")
</pallas_src>

<mosaic_0001>
module attributes {stable_mosaic.version = 11 : i64} {
  func.func @qkv_kernel(%arg0: i32, %arg1: memref<8x32xf32, #tpu.memory_space<vmem>>, %arg2: memref<32x96xbf16, #tpu.memory_space<vmem>>, %arg3: memref<1x96xf32, #tpu.memory_space<vmem>>, %arg4: memref<8x32xbf16, #tpu.memory_space<vmem>>, %arg5: memref<8x32xbf16, #tpu.memory_space<vmem>>, %arg6: memref<8x32xbf16, #tpu.memory_space<vmem>>) attributes {dimension_semantics = [#tpu.dimension_semantics<parallel>], iteration_bounds = array<i64: 2>, scalar_prefetch = 0 : i64, scratch_operands = 0 : i64, tpu.core_type = #tpu.core_type<tc>, window_params = [{transform_indices = @transform_0, window_bounds = array<i64: 8, 32>}, {pipeline_mode = #tpu.pipeline_mode<synchronous>, transform_indices = @transform_1, window_bounds = array<i64: 32, 96>}, {pipeline_mode = #tpu.pipeline_mode<synchronous>, transform_indices = @transform_2, window_bounds = array<i64: 1, 96>}, {transform_indices = @transform_3, window_bounds = array<i64: 8, 32>}, {transform_indices = @transform_4, window_bounds = array<i64: 8, 32>}, {transform_indices = @transform_5, window_bounds = array<i64: 8, 32>}]} {
    %c0 = arith.constant 0 : index
    %c0_0 = arith.constant 0 : index
    %0 = vector.load %arg1[%c0, %c0_0] : memref<8x32xf32, #tpu.memory_space<vmem>>, vector<8x32xf32>
    %1 = arith.truncf %0 : vector<8x32xf32> to vector<8x32xbf16>
    %c0_1 = arith.constant 0 : index
    %c0_2 = arith.constant 0 : index
    %2 = vector.load %arg2[%c0_1, %c0_2] : memref<32x96xbf16, #tpu.memory_space<vmem>>, vector<32x96xbf16>
    %cst = arith.constant dense<0.000000e+00> : vector<8x96xf32>
    %3 = tpu.matmul %1, %2, %cst {dimension_numbers = #tpu.dot_dimension_numbers<[1], [0], [0], [1], [0, 0, 1, 1], [], []>} : vector<8x32xbf16>, vector<32x96xbf16>, vector<8x96xf32> -> vector<8x96xf32>
    %c0_3 = arith.constant 0 : index
    %c0_4 = arith.constant 0 : index
    %4 = vector.load %arg3[%c0_3, %c0_4] : memref<1x96xf32, #tpu.memory_space<vmem>>, vector<1x96xf32>
    %5 = vector.broadcast %4 : vector<1x96xf32> to vector<8x96xf32>
    %6 = arith.addf %3, %5 : vector<8x96xf32>
    %7 = vector.extract_strided_slice %6 {offsets = [0, 0], sizes = [8, 32], strides = [1, 1]} : vector<8x96xf32> to vector<8x32xf32>
    %8 = arith.truncf %7 : vector<8x32xf32> to vector<8x32xbf16>
    %c0_5 = arith.constant 0 : index
    %c0_6 = arith.constant 0 : index
    %9 = vector.load %arg4[%c0_5, %c0_6] : memref<8x32xbf16, #tpu.memory_space<vmem>>, vector<8x32xbf16>
    tpu.vector_store %arg4[%c0_5, %c0_6], %8 {strides = array<i32>} : memref<8x32xbf16, #tpu.memory_space<vmem>>, vector<8x32xbf16>,
    %10 = vector.extract_strided_slice %6 {offsets = [0, 32], sizes = [8, 32], strides = [1, 1]} : vector<8x96xf32> to vector<8x32xf32>
    %11 = arith.truncf %10 : vector<8x32xf32> to vector<8x32xbf16>
    %c0_7 = arith.constant 0 : index
    %c0_8 = arith.constant 0 : index
    %12 = vector.load %arg5[%c0_7, %c0_8] : memref<8x32xbf16, #tpu.memory_space<vmem>>, vector<8x32xbf16>
    tpu.vector_store %arg5[%c0_7, %c0_8], %11 {strides = array<i32>} : memref<8x32xbf16, #tpu.memory_space<vmem>>, vector<8x32xbf16>,
    %13 = vector.extract_strided_slice %6 {offsets = [0, 64], sizes = [8, 32], strides = [1, 1]} : vector<8x96xf32> to vector<8x32xf32>
    %14 = arith.truncf %13 : vector<8x32xf32> to vector<8x32xbf16>
    %c0_9 = arith.constant 0 : index
    %c0_10 = arith.constant 0 : index
    %15 = vector.load %arg6[%c0_9, %c0_10] : memref<8x32xbf16, #tpu.memory_space<vmem>>, vector<8x32xbf16>
    tpu.vector_store %arg6[%c0_9, %c0_10], %14 {strides = array<i32>} : memref<8x32xbf16, #tpu.memory_space<vmem>>, vector<8x32xbf16>,
    return
  }
  func.func @transform_0(%arg0: i32) -> (i32, i32) {
    %c0_i32 = arith.constant 0 : i32
    %c0_i32_0 = arith.constant 0 : i32
    return %arg0, %c0_i32 : i32, i32
  }
  func.func @transform_1(%arg0: i32) -> (i32, i32) {
    %c0_i32 = arith.constant 0 : i32
    %c0_i32_0 = arith.constant 0 : i32
    %c0_i32_1 = arith.constant 0 : i32
    return %c0_i32, %c0_i32_0 : i32, i32
  }
  func.func @transform_2(%arg0: i32) -> (i32, i32) {
    %c0_i32 = arith.constant 0 : i32
    %c0_i32_0 = arith.constant 0 : i32
    %c0_i32_1 = arith.constant 0 : i32
    return %c0_i32, %c0_i32_0 : i32, i32
  }
  func.func @transform_3(%arg0: i32) -> (i32, i32) {
    %c0_i32 = arith.constant 0 : i32
    %c0_i32_0 = arith.constant 0 : i32
    return %arg0, %c0_i32 : i32, i32
  }
  func.func @transform_4(%arg0: i32) -> (i32, i32) {
    %c0_i32 = arith.constant 0 : i32
    %c0_i32_0 = arith.constant 0 : i32
    return %arg0, %c0_i32 : i32, i32
  }
  func.func @transform_5(%arg0: i32) -> (i32, i32) {
    %c0_i32 = arith.constant 0 : i32
    %c0_i32_0 = arith.constant 0 : i32
    return %arg0, %c0_i32 : i32, i32
  }
}

module attributes {stable_mosaic.version = 11 : i64} {
  func.func @flash_attn_kernel(%arg0: i32, %arg1: i32, %arg2: i32, %arg3: memref<1x4x8x8xbf16, #tpu.memory_space<vmem>>, %arg4: memref<1x4x8x8xbf16, #tpu.memory_space<vmem>>, %arg5: memref<1x4x8x8xbf16, #tpu.memory_space<vmem>>, %arg6: memref<1x4x8x8xbf16, #tpu.memory_space<vmem>>, %arg7: memref<4x8x1xf32, #tpu.memory_space<vmem>>, %arg8: memref<4x8x1xf32, #tpu.memory_space<vmem>>, %arg9: memref<4x8x8xf32, #tpu.memory_space<vmem>>) attributes {dimension_semantics = [#tpu.dimension_semantics<parallel>, #tpu.dimension_semantics<parallel>, #tpu.dimension_semantics<arbitrary>], iteration_bounds = array<i64: 2, 1, 1>, scalar_prefetch = 0 : i64, scratch_operands = 3 : i64, tpu.core_type = #tpu.core_type<tc>, window_params = [{transform_indices = @transform_0, window_bounds = array<i64: 1, 4, 8, 8>}, {transform_indices = @transform_1, window_bounds = array<i64: 1, 4, 8, 8>}, {transform_indices = @transform_2, window_bounds = array<i64: 1, 4, 8, 8>}, {transform_indices = @transform_3, window_bounds = array<i64: 1, 4, 8, 8>}]} {
    %c0_i32 = arith.constant 0 : i32
    %0 = arith.cmpi eq, %arg2, %c0_i32 : i32
    %1 = arith.extui %0 : i1 to i32
    %c0_i32_0 = arith.constant 0 : i32
    %2 = arith.cmpi ne, %1, %c0_i32_0 : i32
    scf.if %2 {
      %cst_36 = arith.constant 0xFF800000 : f32
      %40 = vector.broadcast %cst_36 : f32 to vector<4x8x1xf32>
      %c0_37 = arith.constant 0 : index
      %c0_38 = arith.constant 0 : index
      %c0_39 = arith.constant 0 : index
      %41 = vector.load %arg7[%c0_37, %c0_38, %c0_39] : memref<4x8x1xf32, #tpu.memory_space<vmem>>, vector<4x8x1xf32>
      tpu.vector_store %arg7[%c0_37, %c0_38, %c0_39], %40 {strides = array<i32>} : memref<4x8x1xf32, #tpu.memory_space<vmem>>, vector<4x8x1xf32>,
      %cst_40 = arith.constant 0.000000e+00 : f32
      %42 = vector.broadcast %cst_40 : f32 to vector<4x8x1xf32>
      %c0_41 = arith.constant 0 : index
      %c0_42 = arith.constant 0 : index
      %c0_43 = arith.constant 0 : index
      %43 = vector.load %arg8[%c0_41, %c0_42, %c0_43] : memref<4x8x1xf32, #tpu.memory_space<vmem>>, vector<4x8x1xf32>
      tpu.vector_store %arg8[%c0_41, %c0_42, %c0_43], %42 {strides = array<i32>} : memref<4x8x1xf32, #tpu.memory_space<vmem>>, vector<4x8x1xf32>,
      %cst_44 = arith.constant 0.000000e+00 : f32
      %44 = vector.broadcast %cst_44 : f32 to vector<4x8x8xf32>
      %c0_45 = arith.constant 0 : index
      %c0_46 = arith.constant 0 : index
      %c0_47 = arith.constant 0 : index
      %45 = vector.load %arg9[%c0_45, %c0_46, %c0_47] : memref<4x8x8xf32, #tpu.memory_space<vmem>>, vector<4x8x8xf32>
      tpu.vector_store %arg9[%c0_45, %c0_46, %c0_47], %44 {strides = array<i32>} : memref<4x8x8xf32, #tpu.memory_space<vmem>>, vector<4x8x8xf32>,
    } else {
    }
    %c0 = arith.constant 0 : index
    %c0_1 = arith.constant 0 : index
    %c0_2 = arith.constant 0 : index
    %c0_3 = arith.constant 0 : index
    %3 = vector.load %arg3[%c0, %c0_1, %c0_2, %c0_3] : memref<1x4x8x8xbf16, #tpu.memory_space<vmem>>, vector<1x4x8x8xbf16>
    %4 = vector.shape_cast %3 : vector<1x4x8x8xbf16> to vector<4x8x8xbf16>
    %5 = arith.extf %4 : vector<4x8x8xbf16> to vector<4x8x8xf32>
    %cst = arith.constant 0.353553385 : f32
    %6 = vector.broadcast %cst : f32 to vector<4x8x8xf32>
    %7 = arith.mulf %5, %6 : vector<4x8x8xf32>
    %8 = arith.truncf %7 : vector<4x8x8xf32> to vector<4x8x8xbf16>
    %c0_4 = arith.constant 0 : index
    %c0_5 = arith.constant 0 : index
    %c0_6 = arith.constant 0 : index
    %c0_7 = arith.constant 0 : index
    %9 = vector.load %arg4[%c0_4, %c0_5, %c0_6, %c0_7] : memref<1x4x8x8xbf16, #tpu.memory_space<vmem>>, vector<1x4x8x8xbf16>
    %10 = vector.shape_cast %9 : vector<1x4x8x8xbf16> to vector<4x8x8xbf16>
    %c0_8 = arith.constant 0 : index
    %c0_9 = arith.constant 0 : index
    %c0_10 = arith.constant 0 : index
    %c0_11 = arith.constant 0 : index
    %11 = vector.load %arg5[%c0_8, %c0_9, %c0_10, %c0_11] : memref<1x4x8x8xbf16, #tpu.memory_space<vmem>>, vector<1x4x8x8xbf16>
    %12 = vector.shape_cast %11 : vector<1x4x8x8xbf16> to vector<4x8x8xbf16>
    %cst_12 = arith.constant dense<0.000000e+00> : vector<4x8x8xf32>
    %13 = tpu.matmul %8, %10, %cst_12 {dimension_numbers = #tpu.dot_dimension_numbers<[2], [2], [1], [1], [0, 0, 0, 1, 1, 1], [0], [0]>} : vector<4x8x8xbf16>, vector<4x8x8xbf16>, vector<4x8x8xf32> -> vector<4x8x8xf32>
    %c0_13 = arith.constant 0 : index
    %c0_14 = arith.constant 0 : index
    %c0_15 = arith.constant 0 : index
    %14 = vector.load %arg7[%c0_13, %c0_14, %c0_15] : memref<4x8x1xf32, #tpu.memory_space<vmem>>, vector<4x8x1xf32>
    %cst_16 = arith.constant dense<0xFF800000> : vector<4x8xf32>
    %15 = vector.multi_reduction <maximumf>, %13, %cst_16 [2] : vector<4x8x8xf32> to vector<4x8xf32>
    %16 = vector.shape_cast %15 : vector<4x8xf32> to vector<4x8x1xf32>
    %17 = arith.maximumf %14, %16 : vector<4x8x1xf32>
    %18 = arith.subf %14, %17 : vector<4x8x1xf32>
    %19 = math.exp %18 : vector<4x8x1xf32>
    %20 = vector.broadcast %17 : vector<4x8x1xf32> to vector<4x8x8xf32>
    %21 = arith.subf %13, %20 : vector<4x8x8xf32>
    %22 = math.exp %21 : vector<4x8x8xf32>
    %c0_17 = arith.constant 0 : index
    %c0_18 = arith.constant 0 : index
    %c0_19 = arith.constant 0 : index
    %23 = vector.load %arg8[%c0_17, %c0_18, %c0_19] : memref<4x8x1xf32, #tpu.memory_space<vmem>>, vector<4x8x1xf32>
    %24 = arith.mulf %19, %23 : vector<4x8x1xf32>
    %cst_20 = arith.constant dense<0.000000e+00> : vector<4x8xf32>
    %25 = vector.multi_reduction <add>, %22, %cst_20 [2] : vector<4x8x8xf32> to vector<4x8xf32>
    %26 = vector.shape_cast %25 : vector<4x8xf32> to vector<4x8x1xf32>
    %27 = arith.addf %24, %26 : vector<4x8x1xf32>
    %c0_21 = arith.constant 0 : index
    %c0_22 = arith.constant 0 : index
    %c0_23 = arith.constant 0 : index
    %28 = vector.load %arg8[%c0_21, %c0_22, %c0_23] : memref<4x8x1xf32, #tpu.memory_space<vmem>>, vector<4x8x1xf32>
    tpu.vector_store %arg8[%c0_21, %c0_22, %c0_23], %27 {strides = array<i32>} : memref<4x8x1xf32, #tpu.memory_space<vmem>>, vector<4x8x1xf32>,
    %c0_24 = arith.constant 0 : index
    %c0_25 = arith.constant 0 : index
    %c0_26 = arith.constant 0 : index
    %29 = vector.load %arg9[%c0_24, %c0_25, %c0_26] : memref<4x8x8xf32, #tpu.memory_space<vmem>>, vector<4x8x8xf32>
    %30 = vector.broadcast %19 : vector<4x8x1xf32> to vector<4x8x8xf32>
    %31 = arith.mulf %30, %29 : vector<4x8x8xf32>
    %32 = arith.truncf %22 : vector<4x8x8xf32> to vector<4x8x8xbf16>
    %cst_27 = arith.constant dense<0.000000e+00> : vector<4x8x8xf32>
    %33 = tpu.matmul %32, %12, %cst_27 {dimension_numbers = #tpu.dot_dimension_numbers<[2], [1], [1], [2], [0, 0, 0, 1, 1, 2], [0], [0]>} : vector<4x8x8xbf16>, vector<4x8x8xbf16>, vector<4x8x8xf32> -> vector<4x8x8xf32>
    %34 = arith.addf %31, %33 : vector<4x8x8xf32>
    %c0_28 = arith.constant 0 : index
    %c0_29 = arith.constant 0 : index
    %c0_30 = arith.constant 0 : index
    %35 = vector.load %arg9[%c0_28, %c0_29, %c0_30] : memref<4x8x8xf32, #tpu.memory_space<vmem>>, vector<4x8x8xf32>
    tpu.vector_store %arg9[%c0_28, %c0_29, %c0_30], %34 {strides = array<i32>} : memref<4x8x8xf32, #tpu.memory_space<vmem>>, vector<4x8x8xf32>,
    %c0_31 = arith.constant 0 : index
    %c0_32 = arith.constant 0 : index
    %c0_33 = arith.constant 0 : index
    %36 = vector.load %arg7[%c0_31, %c0_32, %c0_33] : memref<4x8x1xf32, #tpu.memory_space<vmem>>, vector<4x8x1xf32>
    tpu.vector_store %arg7[%c0_31, %c0_32, %c0_33], %17 {strides = array<i32>} : memref<4x8x1xf32, #tpu.memory_space<vmem>>, vector<4x8x1xf32>,
    %c0_i32_34 = arith.constant 0 : i32
    %37 = arith.cmpi eq, %arg2, %c0_i32_34 : i32
    %38 = arith.extui %37 : i1 to i32
    %c0_i32_35 = arith.constant 0 : i32
    %39 = arith.cmpi ne, %38, %c0_i32_35 : i32
    scf.if %39 {
      %c0_36 = arith.constant 0 : index
      %c0_37 = arith.constant 0 : index
      %c0_38 = arith.constant 0 : index
      %40 = vector.load %arg9[%c0_36, %c0_37, %c0_38] : memref<4x8x8xf32, #tpu.memory_space<vmem>>, vector<4x8x8xf32>
      %c0_39 = arith.constant 0 : index
      %c0_40 = arith.constant 0 : index
      %c0_41 = arith.constant 0 : index
      %41 = vector.load %arg8[%c0_39, %c0_40, %c0_41] : memref<4x8x1xf32, #tpu.memory_space<vmem>>, vector<4x8x1xf32>
      %42 = vector.broadcast %41 : vector<4x8x1xf32> to vector<4x8x8xf32>
      %43 = arith.divf %40, %42 : vector<4x8x8xf32>
      %44 = arith.truncf %43 : vector<4x8x8xf32> to vector<4x8x8xbf16>
      %c0_42 = arith.constant 0 : index
      %c0_43 = arith.constant 0 : index
      %c0_44 = arith.constant 0 : index
      %c0_45 = arith.constant 0 : index
      %45 = vector.load %arg6[%c0_42, %c0_43, %c0_44, %c0_45] : memref<1x4x8x8xbf16, #tpu.memory_space<vmem>>, vector<1x4x8x8xbf16>
      %46 = vector.shape_cast %45 : vector<1x4x8x8xbf16> to vector<4x8x8xbf16>
      %47 = vector.shape_cast %44 : vector<4x8x8xbf16> to vector<1x4x8x8xbf16>
      tpu.vector_store %arg6[%c0_42, %c0_43, %c0_44, %c0_45], %47 {strides = array<i32>} : memref<1x4x8x8xbf16, #tpu.memory_space<vmem>>, vector<1x4x8x8xbf16>,
    } else {
    }
    return
  }
  func.func @transform_0(%arg0: i32, %arg1: i32, %arg2: i32) -> (i32, i32, i32, i32) {
    %c0_i32 = arith.constant 0 : i32
    %c0_i32_0 = arith.constant 0 : i32
    %c0_i32_1 = arith.constant 0 : i32
    return %arg0, %c0_i32, %arg1, %c0_i32_0 : i32, i32, i32, i32
  }
  func.func @transform_1(%arg0: i32, %arg1: i32, %arg2: i32) -> (i32, i32, i32, i32) {
    %c0_i32 = arith.constant 0 : i32
    %c0_i32_0 = arith.constant 0 : i32
    %c0_i32_1 = arith.constant 0 : i32
    return %arg0, %c0_i32, %arg2, %c0_i32_0 : i32, i32, i32, i32
  }
  func.func @transform_2(%arg0: i32, %arg1: i32, %arg2: i32) -> (i32, i32, i32, i32) {
    %c0_i32 = arith.constant 0 : i32
    %c0_i32_0 = arith.constant 0 : i32
    %c0_i32_1 = arith.constant 0 : i32
    return %arg0, %c0_i32, %arg2, %c0_i32_0 : i32, i32, i32, i32
  }
  func.func @transform_3(%arg0: i32, %arg1: i32, %arg2: i32) -> (i32, i32, i32, i32) {
    %c0_i32 = arith.constant 0 : i32
    %c0_i32_0 = arith.constant 0 : i32
    %c0_i32_1 = arith.constant 0 : i32
    return %arg0, %c0_i32, %arg1, %c0_i32_0 : i32, i32, i32, i32
  }
}

module attributes {stable_mosaic.version = 11 : i64} {
  func.func @out_ln_kernel(%arg0: i32, %arg1: memref<8x32xbf16, #tpu.memory_space<vmem>>, %arg2: memref<8x32xf32, #tpu.memory_space<vmem>>, %arg3: memref<32x32xbf16, #tpu.memory_space<vmem>>, %arg4: memref<1x32xf32, #tpu.memory_space<vmem>>, %arg5: memref<1x32xf32, #tpu.memory_space<vmem>>, %arg6: memref<1x32xf32, #tpu.memory_space<vmem>>, %arg7: memref<8x32xf32, #tpu.memory_space<vmem>>) attributes {dimension_semantics = [#tpu.dimension_semantics<parallel>], iteration_bounds = array<i64: 2>, scalar_prefetch = 0 : i64, scratch_operands = 0 : i64, tpu.core_type = #tpu.core_type<tc>, window_params = [{transform_indices = @transform_0, window_bounds = array<i64: 8, 32>}, {transform_indices = @transform_1, window_bounds = array<i64: 8, 32>}, {pipeline_mode = #tpu.pipeline_mode<synchronous>, transform_indices = @transform_2, window_bounds = array<i64: 32, 32>}, {pipeline_mode = #tpu.pipeline_mode<synchronous>, transform_indices = @transform_3, window_bounds = array<i64: 1, 32>}, {pipeline_mode = #tpu.pipeline_mode<synchronous>, transform_indices = @transform_4, window_bounds = array<i64: 1, 32>}, {pipeline_mode = #tpu.pipeline_mode<synchronous>, transform_indices = @transform_5, window_bounds = array<i64: 1, 32>}, {transform_indices = @transform_6, window_bounds = array<i64: 8, 32>}]} {
    %c0 = arith.constant 0 : index
    %c0_0 = arith.constant 0 : index
    %0 = vector.load %arg1[%c0, %c0_0] : memref<8x32xbf16, #tpu.memory_space<vmem>>, vector<8x32xbf16>
    %c0_1 = arith.constant 0 : index
    %c0_2 = arith.constant 0 : index
    %1 = vector.load %arg3[%c0_1, %c0_2] : memref<32x32xbf16, #tpu.memory_space<vmem>>, vector<32x32xbf16>
    %cst = arith.constant dense<0.000000e+00> : vector<8x32xf32>
    %2 = tpu.matmul %0, %1, %cst {dimension_numbers = #tpu.dot_dimension_numbers<[1], [0], [0], [1], [0, 0, 1, 1], [], []>} : vector<8x32xbf16>, vector<32x32xbf16>, vector<8x32xf32> -> vector<8x32xf32>
    %c0_3 = arith.constant 0 : index
    %c0_4 = arith.constant 0 : index
    %3 = vector.load %arg4[%c0_3, %c0_4] : memref<1x32xf32, #tpu.memory_space<vmem>>, vector<1x32xf32>
    %4 = vector.broadcast %3 : vector<1x32xf32> to vector<8x32xf32>
    %5 = arith.addf %2, %4 : vector<8x32xf32>
    %c0_5 = arith.constant 0 : index
    %c0_6 = arith.constant 0 : index
    %6 = vector.load %arg2[%c0_5, %c0_6] : memref<8x32xf32, #tpu.memory_space<vmem>>, vector<8x32xf32>
    %7 = arith.addf %5, %6 : vector<8x32xf32>
    %cst_7 = arith.constant dense<0.000000e+00> : vector<8xf32>
    %8 = vector.multi_reduction <add>, %7, %cst_7 [1] : vector<8x32xf32> to vector<8xf32>
    %9 = vector.shape_cast %8 : vector<8xf32> to vector<8x1xf32>
    %cst_8 = arith.constant 3.200000e+01 : f32
    %10 = vector.broadcast %cst_8 : f32 to vector<8x1xf32>
    %11 = arith.divf %9, %10 : vector<8x1xf32>
    %12 = vector.broadcast %11 : vector<8x1xf32> to vector<8x32xf32>
    %13 = arith.subf %7, %12 : vector<8x32xf32>
    %14 = arith.mulf %13, %13 : vector<8x32xf32>
    %cst_9 = arith.constant dense<0.000000e+00> : vector<8xf32>
    %15 = vector.multi_reduction <add>, %14, %cst_9 [1] : vector<8x32xf32> to vector<8xf32>
    %16 = vector.shape_cast %15 : vector<8xf32> to vector<8x1xf32>
    %cst_10 = arith.constant 3.200000e+01 : f32
    %17 = vector.broadcast %cst_10 : f32 to vector<8x1xf32>
    %18 = arith.divf %16, %17 : vector<8x1xf32>
    %19 = vector.broadcast %11 : vector<8x1xf32> to vector<8x32xf32>
    %20 = arith.subf %7, %19 : vector<8x32xf32>
    %cst_11 = arith.constant 9.99999974E-6 : f32
    %21 = vector.broadcast %cst_11 : f32 to vector<8x1xf32>
    %22 = arith.addf %18, %21 : vector<8x1xf32>
    %23 = math.rsqrt %22 : vector<8x1xf32>
    %24 = vector.broadcast %23 : vector<8x1xf32> to vector<8x32xf32>
    %25 = arith.mulf %20, %24 : vector<8x32xf32>
    %c0_12 = arith.constant 0 : index
    %c0_13 = arith.constant 0 : index
    %26 = vector.load %arg5[%c0_12, %c0_13] : memref<1x32xf32, #tpu.memory_space<vmem>>, vector<1x32xf32>
    %27 = vector.broadcast %26 : vector<1x32xf32> to vector<8x32xf32>
    %28 = arith.mulf %25, %27 : vector<8x32xf32>
    %c0_14 = arith.constant 0 : index
    %c0_15 = arith.constant 0 : index
    %29 = vector.load %arg6[%c0_14, %c0_15] : memref<1x32xf32, #tpu.memory_space<vmem>>, vector<1x32xf32>
    %30 = vector.broadcast %29 : vector<1x32xf32> to vector<8x32xf32>
    %31 = arith.addf %28, %30 : vector<8x32xf32>
    %c0_16 = arith.constant 0 : index
    %c0_17 = arith.constant 0 : index
    %32 = vector.load %arg7[%c0_16, %c0_17] : memref<8x32xf32, #tpu.memory_space<vmem>>, vector<8x32xf32>
    tpu.vector_store %arg7[%c0_16, %c0_17], %31 {strides = array<i32>} : memref<8x32xf32, #tpu.memory_space<vmem>>, vector<8x32xf32>,
    return
  }
  func.func @transform_0(%arg0: i32) -> (i32, i32) {
    %c0_i32 = arith.constant 0 : i32
    %c0_i32_0 = arith.constant 0 : i32
    return %arg0, %c0_i32 : i32, i32
  }
  func.func @transform_1(%arg0: i32) -> (i32, i32) {
    %c0_i32 = arith.constant 0 : i32
    %c0_i32_0 = arith.constant 0 : i32
    return %arg0, %c0_i32 : i32, i32
  }
  func.func @transform_2(%arg0: i32) -> (i32, i32) {
    %c0_i32 = arith.constant 0 : i32
    %c0_i32_0 = arith.constant 0 : i32
    %c0_i32_1 = arith.constant 0 : i32
    return %c0_i32, %c0_i32_0 : i32, i32
  }
  func.func @transform_3(%arg0: i32) -> (i32, i32) {
    %c0_i32 = arith.constant 0 : i32
    %c0_i32_0 = arith.constant 0 : i32
    %c0_i32_1 = arith.constant 0 : i32
    return %c0_i32, %c0_i32_0 : i32, i32
  }
  func.func @transform_4(%arg0: i32) -> (i32, i32) {
    %c0_i32 = arith.constant 0 : i32
    %c0_i32_0 = arith.constant 0 : i32
    %c0_i32_1 = arith.constant 0 : i32
    return %c0_i32, %c0_i32_0 : i32, i32
  }
  func.func @transform_5(%arg0: i32) -> (i32, i32) {
    %c0_i32 = arith.constant 0 : i32
    %c0_i32_0 = arith.constant 0 : i32
    %c0_i32_1 = arith.constant 0 : i32
    return %c0_i32, %c0_i32_0 : i32, i32
  }
  func.func @transform_6(%arg0: i32) -> (i32, i32) {
    %c0_i32 = arith.constant 0 : i32
    %c0_i32_0 = arith.constant 0 : i32
    return %arg0, %c0_i32 : i32, i32
  }
}

</mosaic_0001>

<bundles_post_ra>
// kernel: multi_head_attention.3
= control target key start
LH: loop header
LB: loop body
LE: loop exit
PB: predicated region body
PF: predicated region fallthrough
CT: control target
= control target key end

     0   :  { %s524_s18 = smov 0   ;;  %s556_s0 = inlined_call_operand.vmem [shape: f32[16,32], index: 0, kind: input, shape index: {}]   ;;  %s557_s1 = inlined_call_operand.vmem [shape: bf16[32,96], index: 1, kind: input, shape index: {}]   ;;  %s558_s2 = inlined_call_operand.vmem [shape: f32[1,96], index: 2, kind: input, shape index: {}]   ;;  %s559_s3 = inlined_call_operand.vmem [shape: bf16[16,32], index: 3, kind: output, shape index: {0}]   ;;  %s560_s4 = inlined_call_operand.vmem [shape: bf16[16,32], index: 4, kind: output, shape index: {1}]   ;;  %s561_s5 = inlined_call_operand.vmem [shape: bf16[16,32], index: 5, kind: output, shape index: {2}]  }
   0x1 LB: > { %s440_s19 = sadd.s32 4294967295, %s488_s18   ;;  %p444_p0 = scmp.ge.s32.totalorder %s488_s18, 1  ;;  %s488_s18 = sphi %s524_s18, %s16_s18  }
   0x2   : > { %p191_p1 = scmp.lt.s32.totalorder %s488_s18, 3 }
   0x4   : > { %p192_p2 = pnand %p444_p0, %p191_p1 }
   0x5   : > { %v480_v0 = vld [vmem:[%s557_s1] sm:$0xff] (!%p192_p2)   ;;  %v490_v1 = vmov (!%p192_p2), 0.0   ;;  %v481_v2 = vld [vmem:[%s557_s1 + $0x8] sm:$0xff] (!%p192_p2)   ;;  %vm491_vm0 = vmmov (!%p192_p2), 0   ;;  %p225_p3 = scmp.lt.s32.totalorder (!%p192_p2), %s440_s19, 1  ;;  %vm267_vm1 = vcmask (!%p192_p2), 261120  }
   0x6   : > { %195 = sbr.rel (%p192_p2) target bundleno = 355 (0x163), region = 32  ;;  %460 = vmatprep.subr.bf16.mxu0 (!%p192_p2), %v490_v1  ;;  %464 = vmatprep.mubr.msk.bf16.mxu0 (!%p192_p2), %vm491_vm0, %v490_v1  ;;  %v449_v5 = vld [vmem:[%s558_s2] ss:$0 sm:$0xff] (!%p192_p2)  ;;  %vm312_vm2 = vcmask (!%p192_p2), 257024   ;;  %s492_s9 = smov (!%p192_p2), 96  }
   0x7   : > { %461 = vmatpush3.bf16.msra.mxu0 (!%p192_p2), %v480_v0  ;;  %s493_s10 = smov (!%p192_p2), 64  }
   0x8   : > { %462 = vmatprep.subr.bf16.mxu0 (!%p192_p2), %v490_v1 }
   0xb   : > { %463 = vmatpush3.bf16.msra.mxu0 (!%p192_p2), %v481_v2 }
   0xd   : > { %s563_s19 = smov (!%p225_p3, %s440_s19), 1 }
   0xe   : > { %s445_s24 = sshll.u32 %s563_s19, 3  ;;  %s446_s30 = sshll.u32 %s563_s19, 2 }
   0xf   : > { %s228_s27 = scalar_lea.vmem %s556_s0, %s445_s24  ;;  %s232_s8 = scalar_lea.vmem %s559_s3, %s446_s30 }
  0x10   : > { %v242_v3 = vld [vmem:[%s228_s27] sm:$0xff]  ;;  %s236_s13 = scalar_lea.vmem %s560_s4, %s446_s30  ;;  %s240_s16 = scalar_lea.vmem %s561_s5, %s446_s30 }
  0x11   : > { %v243_v4 = vpack.c.bf16 %v242_v3, %v242_v3 }
  0x13   : > { %465 = vmatmul.mubr.msk.bf16.vlgmr.msra.gmra.mrb[0].mxu0 %vm267_vm1, %v243_v4 }
  0xe6   : > { %v305_v6 = vpop.f32.mrb[0].mxu0 }
  0xe7   : > { %v306_v7 = vadd.f32 %v449_v5, %v305_v6  ;;  %v466_v8 = vpop.f32.mrb[1].mxu0 }
  0xe8   : > { %v308_v9 = vpop.f32.mrb[2].mxu0 }
  0xe9   : > { %v311_v10 = vpack.c.bf16 %v306_v7, %v306_v7  ;;  %v467_v11 = vpop.f32.mrb[3].mxu0 }
  0xeb   : > { %317 = vrot.lane.b32.xlu0 %v311_v10, %s492_s9  ;;  %313 = vst.msk [vmem:[%s232_s8] sm:$0xf] %vm312_vm2, %v311_v10 }
  0xef   : > { %321 = vrot.lane.b32.xlu0 %v311_v10, %s493_s10 }
 0x15d   : > { %v318_v12 = vpop.permute.xlu0 %317 }
 0x15e   : > { %320 = vst.msk [vmem:[%s236_s13] sm:$0xf] %vm312_vm2, %v318_v12 }
 0x161   : > { %v322_v13 = vpop.permute.xlu0 %321 }
 0x162   : > { %324 = vst.msk [vmem:[%s240_s16] sm:$0xf] %vm312_vm2, %v322_v13 }
 0x163 PF: > { %s16_s18 = sadd.s32 1, %s488_s18  }
 0x164   : > { %p13_p4 = scmp.ge.s32.totalorder %s16_s18, 4  }
 0x166   :  { %15 = sbr.rel (!%p13_p4) target bundleno = 1 (0x1), region = 86 }

// kernel: multi_head_attention.5
= control target key start
LH: loop header
LB: loop body
LE: loop exit
PB: predicated region body
PF: predicated region fallthrough
CT: control target
= control target key end

     0   :  { %11 = vsyncpa [#allocation3], 0  ;;  %s748_s0 = inlined_call_operand.vmem [shape: bf16[16,32], index: 0, kind: input, shape index: {}]   ;;  %s749_s1 = inlined_call_operand.vmem [shape: f32[16,32], index: 1, kind: input, shape index: {}]   ;;  %s750_s2 = inlined_call_operand.vmem [shape: bf16[32,32], index: 2, kind: input, shape index: {}]   ;;  %s751_s3 = inlined_call_operand.vmem [shape: f32[1,32], index: 3, kind: input, shape index: {}]   ;;  %s752_s4 = inlined_call_operand.vmem [shape: f32[1,32], index: 4, kind: input, shape index: {}]   ;;  %s753_s5 = inlined_call_operand.vmem [shape: f32[1,32], index: 5, kind: input, shape index: {}]   ;;  %s754_s6 = inlined_call_operand.hbm [shape: f32[16,32], index: 6, kind: output, shape index: {}]  }
   0x1   :  { %13 = vsyncpa [#allocation3 + $0x1], 0  ;;  %s626_s21 = smov 0   ;;  %s628_s22 = smov 0  }
   0x2   :  { %s630_s23 = smov 0   ;;  %s632_s24 = smov 0  }
   0x3 LB: > { %s647_s25 = sadd.s32 4294967295, %s586_s24   ;;  %s451_s26 = sadd.s32 4294967294, %s586_s24   ;;  %s586_s24 = sphi %s632_s24, %s760_s24   ;;  %s582_s23 = sphi %s630_s23, %s759_s23   ;;  %s578_s22 = sphi %s628_s22, %s758_s22   ;;  %s574_s21 = sphi %s626_s21, %s757_s21  }
   0x4   : > { %s651_s27 = sadd.s32 1, %s586_s24   ;;  %s162_s28 = sadd.s32 1, %s582_s23 }
   0x5   : > { %s159_s29 = ssub.s32 %s586_s24, %s651_s27  ;;  %p172_p0 = scmp.ne.s32.totalorder %s582_s23, %s578_s22 }
   0x6   : > { %p160_p1 = scmp.eq.s32.totalorder %s159_s29, 0  ;;  %p173_p2 = scmp.eq.s32.totalorder %s647_s25, 1 }
   0x7   : > { %p178_p3 = scmp.ne.s32.totalorder %s578_s22, %s574_s21  ;;  %p179_p4 = scmp.eq.s32.totalorder %s451_s26, 1 }
   0x8   : > { %s662_s30 = scalar_select %p160_p1, %s582_s23, %s162_s28  }
   0x9   : > { %p664_p5 = por %p173_p2, %p172_p0  ;;  %p668_p6 = por %p179_p4, %p178_p3 }
   0xa   : > { %p454_p7 = scmp.ge.s32.totalorder %s586_s24, 1  ;;  %p223_p8 = scmp.lt.s32.totalorder %s586_s24, 3 }
   0xc   : > { %p224_p9 = pnand %p454_p7, %p223_p8 }
   0xd   : > { %v520_v0 = vld [vmem:[%s750_s2] sm:$0xff] (!%p224_p9)   ;;  %v588_v1 = vmov (!%p224_p9), 0.0   ;;  %v521_v2 = vld [vmem:[%s750_s2 + $0x8] sm:$0xff] (!%p224_p9)   ;;  %vm589_vm0 = vmmov (!%p224_p9), 0   ;;  %p256_p10 = scmp.lt.s32.totalorder (!%p224_p9), %s647_s25, 1  ;;  %vm289_vm1 = vcmask (!%p224_p9), 261120  }
   0xe   : > { %227 = sbr.rel (%p224_p9) target bundleno = 569 (0x239), region = 44  ;;  %471 = vmatprep.subr.bf16.mxu0 (!%p224_p9), %v588_v1  ;;  %475 = vmatprep.mubr.msk.bf16.mxu0 (!%p224_p9), %vm589_vm0, %v588_v1  ;;  %v458_v4 = vld [vmem:[%s751_s3] ss:$0 sm:$0xff] (!%p224_p9)  ;;  %s253_s9 = sand.u32 (!%p224_p9), 1, %s578_s22  }
   0xf   : > { %472 = vmatpush3.bf16.msra.mxu0 (!%p224_p9), %v520_v0  ;;  %s455_s10 = sshll.u32 (!%p224_p9), %s253_s9, 3  ;;  %v462_v22 = vld [vmem:[%s752_s4] ss:$0 sm:$0xff] (!%p224_p9)  ;;  %s465_s15 = sshll.u32 (!%p224_p9), %s647_s25, 7 }
  0x10   : > { %473 = vmatprep.subr.bf16.mxu0 (!%p224_p9), %v588_v1  ;;  %v463_v24 = vld [vmem:[%s753_s5] ss:$0 sm:$0xff] (!%p224_p9)  ;;  %s255_s16 = scalar_lea.vmem (!%p224_p9), [#allocation2], %s455_s10  ;;  %s705_s20 = scalar_lea.hbm (!%p224_p9), %s754_s6, %s465_s15 }
  0x13   : > { %474 = vmatpush3.bf16.msra.mxu0 (!%p224_p9), %v521_v2 }
  0x15   : > { %s257_s13 = scalar_select %p256_p10, %s647_s25, 1 }
  0x16   : > { %s590_s25 = smov [#allocation2]  }
  0x17   : > { %s456_s14 = sshll.u32 %s257_s13, 2  ;;  %s457_s18 = sshll.u32 %s257_s13, 3 }
  0x18   : > { %s259_s17 = scalar_lea.vmem %s748_s0, %s456_s14  ;;  %s263_s26 = scalar_lea.vmem %s749_s1, %s457_s18 }
  0x19   : > { %v265_v3 = vld [vmem:[%s259_s17] sm:$0xf]  ;;  %s380_s17 = sshll.u32 %s255_s16, 4  ;;  %s528_s29 = sshll.u32 %s590_s25, 4  ;;  %s707_s17 = int_to_ptr.vmem [resolvable:$true] %s380_s17  ;;  %s529_s29 = int_to_ptr.vmem [resolvable:$false] %s528_s29 }
  0x1a   : > { %476 = vmatmul.mubr.msk.bf16.vlgmr.msra.gmra.mrb[0].mxu0 %vm289_vm1, %v265_v3  ;;  %v333_v6 = vld [vmem:[%s263_s26] sm:$0xff]  ;;  %s367_s26 = scalar_lea.sflag [#allocation3], %s253_s9  ;;  %s524_s28 = scalar_lea.vmem %s707_s17, 128 }
  0x1b   : > { %p525_p11 = scmp.ne.s32.totalorder %s707_s17, %s524_s28  ;;  %s530_s10 = scalar_lea.vmem %s529_s29, 256 }
  0x1c   : > { %p531_p0 = scmp.lt.s32.totalorder %s707_s17, %s529_s29  ;;  %p532_p1 = scmp.lt.s32.totalorder %s530_s10, %s524_s28 }
  0x1d   : > { %p526_p12 = pnand %p525_p11, %p664_p5 }
  0x1e   : > { %p533_p2 = por %p532_p1, %p531_p0 }
  0x1f   : > { %p527_p13 = pneg %p526_p12 }
  0x21   : > { %p534_p3 = pnand %p533_p2, %p527_p13 }
  0xed   : > { %v327_v5 = vpop.f32.mrb[0].mxu0 }
  0xee   : > { %v328_v7 = vadd.f32 %v458_v4, %v327_v5  ;;  %v477_v8 = vpop.f32.mrb[1].mxu0 }
  0xef   : > { %v330_v9 = vpop.f32.mrb[2].mxu0 }
  0xf0   : > { %v478_v10 = vpop.f32.mrb[3].mxu0  ;;  %v334_v11 = vadd.f32 %v333_v6, %v328_v7 }
  0xf2   : > { %v335_v12 = vsel %vm289_vm1, %v334_v11, 0.0 }
  0xf3   : > { %336 = vadd.xlane.f32.xlu0 %v335_v12 }
 0x180   : > { %v337_v13 = vpop.xlane.xlu0 %336 }
 0x181   : > { %v339_v14 = vmul.f32 0.03125, %v337_v13 }
 0x183   : > { %v340_v15 = vsub.f32 %v334_v11, %v339_v14 }
 0x185   : > { %v341_v16 = vmul.f32 %v340_v15, %v340_v15 }
 0x187   : > { %v342_v17 = vsel %vm289_vm1, %v341_v16, 0.0 }
 0x188   : > { %343 = vadd.xlane.f32.xlu0 %v342_v17 }
 0x215   : > { %v344_v18 = vpop.xlane.xlu0 %343 }
 0x216   : > { %v345_v19 = vmul.f32 0.03125, %v344_v18 }
 0x218   : > { %v346_v20 = vadd.f32 1e-05, %v345_v19 }
 0x21a   : > { %522 = vrsqrt.f32 %v346_v20 }
 0x224   : > { %v523_v21 = vpop.eup %522 }
 0x225   : > { %v348_v23 = vmul.f32 %v523_v21, %v340_v15 }
 0x227   : > { %v356_v25 = vmul.f32 %v462_v22, %v348_v23 }
 0x229   : > { %v364_v26 = vadd.f32 %v463_v24, %v356_v25 }
 0x22b   : > { %365 = vst.msk [vmem:[%s255_s16] sm:$0xff] %vm289_vm1, %v364_v26 }
 0x22c   : > { %537 = shalt.err (!%p534_p3)
}
 0x22d   : > { %s538_s9 = scalar_lea.hbm %s705_s20, 128  ;;  %s542_s13 = scalar_lea.hbm %s754_s6, 256 }
 0x22e   : > { %p539_p4 = scmp.ne.s32.totalorder %s705_s20, %s538_s9  ;;  %p543_p9 = scmp.lt.u32.totalorder %s705_s20, %s754_s6 }
 0x22f   : > { %p544_p10 = scmp.lt.u32.totalorder %s542_s13, %s538_s9  ;;  %p546_p12 = scmp.lt.u32.totalorder %s538_s9, %s705_s20 }
 0x230   : > { %p540_p7 = pnand %p539_p4, %p664_p5 }
 0x231   : > { %p545_p11 = por %p544_p10, %p543_p9 }
 0x232   : > { %p541_p8 = pneg %p540_p7 }
 0x233   : > { %p547_p13 = por %p546_p12, %p545_p11 }
 0x235   : > { %p548_p0 = pnand %p547_p13, %p541_p8 }
 0x237   : > { %551 = shalt.err (!%p548_p0)
}
 0x238   : > { %479 = dma.vmem_to_hbm [thread:$0]  (%p664_p5), %s707_s17, 128, %s705_s20, %s367_s26  }
 0x239 PF: > { %p485_p1 = scmp.ge.s32.totalorder %s586_s24, 2  ;;  %s392_s16 = sand.u32 1, %s574_s21  }
 0x23a   : > { %s393_s18 = scalar_lea.sflag [#allocation3], %s392_s16 }
 0x23b   : > { %p482_p2 = pnand %p485_p1, %p668_p6 }
 0x23d   : > { %569 = dma.done.wait (!%p482_p2), %s393_s18, 128  }
 0x23e   : > { %571 = vsyncadd (!%p482_p2), %s393_s18, 4294967168  ;;  %p16_p3 = scmp.ge.s32.totalorder %s651_s27, 4   ;;  %s757_s21 = smov %s578_s22 }
 0x23f   : > { %s758_s22 = smov %s582_s23  ;;  %s759_s23 = smov %s662_s30 }
 0x240   : > { %s760_s24 = smov %s651_s27  ;;  %18 = sbr.rel (!%p16_p3) target bundleno = 3 (0x3), region = 82 }
 0x247   :  { %398 = vsyncpa [#allocation3], 1 }
 0x248   :  { %400 = vsyncpa [#allocation3 + $0x1], 1 }

// kernel: multi_head_attention.4
= control target key start
LH: loop header
LB: loop body
LE: loop exit
PB: predicated region body
PF: predicated region fallthrough
CT: control target
= control target key end

     0   :  { %s1193_s12 = smov 0   ;;  %s1195_s13 = smov 0   ;;  %s1379_s0 = inlined_call_operand.vmem [shape: bf16[2,4,8,8], index: 0, kind: input, shape index: {}]   ;;  %s1380_s1 = inlined_call_operand.vmem [shape: bf16[2,4,8,8], index: 1, kind: input, shape index: {}]   ;;  %s1381_s2 = inlined_call_operand.vmem [shape: bf16[2,4,8,8], index: 2, kind: input, shape index: {}]   ;;  %s1382_s3 = inlined_call_operand.vmem [shape: bf16[2,4,8,8], index: 3, kind: output, shape index: {}]  }
   0x1   :  { %s1197_s14 = smov 0  }
   0x2 LB: > { %s32_s15 = sadd.s32 1, %s1163_s13  ;;  %p995_p0 = scmp.ge.s32.totalorder %s1167_s14, 1  ;;  %s1167_s14 = sphi %s1197_s14, %s13_s14   ;;  %s1163_s13 = sphi %s1195_s13, %s1384_s13   ;;  %s1159_s12 = sphi %s1193_s12, %s1383_s12  }
   0x3   : > { %p34_p1 = scmp.ge.s32.totalorder %s32_s15, 2  ;;  %p193_p2 = scmp.lt.s32.totalorder %s1167_s14, 3 }
   0x5   : > { %s1386_s15 = smov (%p34_p1, %s32_s15), 0  ;;  %p194_p3 = pnand %p995_p0, %p193_p2 }
   0x6   : > { %p239_p4 = scmp.lt.s32.totalorder (!%p194_p3), %s1159_s12, 1  ;;  %vm285_vm0 = vcmask (!%p194_p3), 64512   ;;  %v1169_v0 = vmov (!%p194_p3), 0.0   ;;  %vm1170_vm1 = vmmov (!%p194_p3), 0   ;;  %vm276_vm2 = vcmask (!%p194_p3), 7168  }
   0x7   : > { %197 = sbr.rel (%p194_p3) target bundleno = 835 (0x343), region = 32  ;;  %1043 = vmatprep.subr.bf16.mxu0 (!%p194_p3), %v1169_v0  ;;  %286 = vst.msk [vmem:[#allocation4] sm:$0xff] (!%p194_p3), %vm285_vm0, %v1169_v0  ;;  %287 = vst.msk [vmem:[#allocation4 + $0x8] sm:$0xff] (!%p194_p3), %vm285_vm0, %v1169_v0  ;;  %1049 = vmatprep.subr.bf16.mxu1 (!%p194_p3), %v1169_v0  ;;  %v1171_v23 = vmov (!%p194_p3), -inf   ;;  %v1172_v44 = vmov (!%p194_p3), 0   ;;  %vm627_vm3 = vcmask (!%p194_p3), 1043456  }
   0x8   : > { %288 = vst.msk [vmem:[#allocation4 + $0x10] sm:$0xff] (!%p194_p3), %vm285_vm0, %v1169_v0  ;;  %289 = vst.msk [vmem:[#allocation4 + $0x18] sm:$0xff] (!%p194_p3), %vm285_vm0, %v1169_v0  ;;  %1045 = vmatprep.mubr.msk.bf16.mxu0 (!%p194_p3), %vm1170_vm1, %v1169_v0  ;;  %1051 = vmatprep.mubr.msk.bf16.mxu1 (!%p194_p3), %vm1170_vm1, %v1169_v0  ;;  %vm864_vm4 = vcmask (!%p194_p3), 60416  }
   0x9   : > { %277 = vst.msk [vmem:[#allocation2] sm:$0xff] (!%p194_p3), %vm276_vm2, %v1171_v23  ;;  %278 = vst.msk [vmem:[#allocation2 + $0x8] sm:$0xff] (!%p194_p3), %vm276_vm2, %v1171_v23  ;;  %1119 = vset.pattern.permute.xlu0 (!%p194_p3), %v1172_v44  ;;  %1120 = vset.pattern.permute.xlu1 (!%p194_p3), %v1172_v44 }
   0xa   : > { %279 = vst.msk [vmem:[#allocation2 + $0x10] sm:$0xff] (!%p194_p3), %vm276_vm2, %v1171_v23  ;;  %280 = vst.msk [vmem:[#allocation2 + $0x18] sm:$0xff] (!%p194_p3), %vm276_vm2, %v1171_v23 }
   0xb   : > { %281 = vst.msk [vmem:[#allocation3] sm:$0xff] (!%p194_p3), %vm276_vm2, %v1169_v0  ;;  %282 = vst.msk [vmem:[#allocation3 + $0x8] sm:$0xff] (!%p194_p3), %vm276_vm2, %v1169_v0 }
   0xc   : > { %283 = vst.msk [vmem:[#allocation3 + $0x10] sm:$0xff] (!%p194_p3), %vm276_vm2, %v1169_v0  ;;  %284 = vst.msk [vmem:[#allocation3 + $0x18] sm:$0xff] (!%p194_p3), %vm276_vm2, %v1169_v0 }
   0xe   : > { %s1388_s12 = smov (!%p239_p4, %s1159_s12), 1 }
   0xf   : > { %s1225_s16 = sshll.u32 %s1388_s12, 4 }
  0x10   : > { %s254_s19 = scalar_lea.vmem %s1380_s1, %s1225_s16  ;;  %s246_s22 = scalar_lea.vmem %s1379_s0, %s1225_s16  ;;  %v1283_v45 = vld [vmem:[#allocation2] sm:$0xff]  ;;  %v1288_v48 = vld [vmem:[#allocation2 + $0x8] sm:$0xff] }
  0x11   : > { %v306_v1 = vld [vmem:[%s254_s19] sm:$0xf]  ;;  %v307_v2 = vld [vmem:[%s254_s19 + $0x4] sm:$0xf]  ;;  %v1026_v7 = vld [vmem:[%s246_s22 + $0x8] sm:$0xff]   ;;  %s262_s25 = scalar_lea.vmem %s1381_s2, %s1225_s16  ;;  %s270_s28 = scalar_lea.vmem %s1382_s3, %s1225_s16 }
  0x12   : > { %v319_v3 = vsel %vm285_vm0, %v306_v1, 0  ;;  %v365_v4 = vsel %vm285_vm0, %v307_v2, 0  ;;  %v1019_v5 = vld [vmem:[%s246_s22] sm:$0xff]   ;;  %v308_v9 = vld [vmem:[%s254_s19 + $0x8] sm:$0xf]  ;;  %v1024_v13 = vunpack.c.l.bf16 %v1026_v7  ;;  %v1025_v14 = vunpack.c.h.bf16 %v1026_v7  ;;  %v1298_v52 = vld [vmem:[#allocation2 + $0x10] sm:$0xff] }
  0x13   : > { %1044 = vmatpush3.bf16.xpose.msra.mxu0 %v319_v3  ;;  %1050 = vmatpush3.bf16.xpose.msra.mxu1 %v365_v4  ;;  %v1020_v6 = vunpack.c.l.bf16 %v1019_v5  ;;  %v1021_v8 = vunpack.c.h.bf16 %v1019_v5  ;;  %v309_v12 = vld [vmem:[%s254_s19 + $0xc] sm:$0xf]  ;;  %v411_v17 = vsel %vm285_vm0, %v308_v9, 0  ;;  %v1308_v56 = vld [vmem:[#allocation2 + $0x18] sm:$0xff]  ;;  %v310_v61 = vld [vmem:[%s262_s25] sm:$0xf] }
  0x14   : > { %1055 = vmatprep.subr.bf16.mxu0 %v1169_v0  ;;  %1061 = vmatprep.subr.bf16.mxu1 %v1169_v0  ;;  %v457_v18 = vsel %vm285_vm0, %v309_v12, 0  ;;  %v300_v19 = vmul.f32 0.35355338, %v1024_v13  ;;  %v301_v20 = vmul.f32 0.35355338, %v1025_v14  ;;  %v629_v62 = vsel %vm627_vm3, %v310_v61, 0 }
  0x15   : > { %v298_v10 = vmul.f32 0.35355338, %v1020_v6  ;;  %v299_v11 = vmul.f32 0.35355338, %v1021_v8  ;;  %v311_v63 = vld [vmem:[%s262_s25 + $0x4] sm:$0xf] }
  0x16   : > { %v304_v21 = vpack.c.bf16 %v300_v19, %v300_v19  ;;  %v305_v22 = vpack.c.bf16 %v301_v20, %v301_v20  ;;  %v675_v1 = vsel %vm627_vm3, %v311_v63, 0  ;;  %v312_v2 = vld [vmem:[%s262_s25 + $0x8] sm:$0xf]  ;;  %v313_v4 = vld [vmem:[%s262_s25 + $0xc] sm:$0xf]  ;;  %v565_v44 = vld [vmem:[#allocation3 + $0x10] sm:$0xff] }
  0x17   : > { %v302_v15 = vpack.c.bf16 %v298_v10, %v298_v10  ;;  %v303_v16 = vpack.c.bf16 %v299_v11, %v299_v11  ;;  %v721_v3 = vsel %vm627_vm3, %v312_v2, 0  ;;  %v767_v5 = vsel %vm627_vm3, %v313_v4, 0 }
  0x1a   : > { %1046 = vmatmul.mubr.msk.bf16.vlgmr.msra.gmra.mrb[0].mxu0 %vm285_vm0, %v302_v15  ;;  %1052 = vmatmul.mubr.msk.bf16.vlgmr.msra.gmra.mrb[0].mxu1 %vm285_vm0, %v303_v16 }
  0x1b   : > { %1056 = vmatpush3.bf16.xpose.msra.mxu0 %v411_v17  ;;  %1062 = vmatpush3.bf16.xpose.msra.mxu1 %v457_v18 }
  0x1c   : > { %1057 = vmatprep.mubr.msk.bf16.mxu0 %vm1170_vm1, %v1169_v0  ;;  %1063 = vmatprep.mubr.msk.bf16.mxu1 %vm1170_vm1, %v1169_v0 }
  0x1d   : > { %1067 = vmatprep.subr.bf16.mxu0 %v1169_v0  ;;  %1073 = vmatprep.subr.bf16.mxu1 %v1169_v0 }
  0x22   : > { %1058 = vmatmul.mubr.msk.bf16.vlgmr.msra.gmra.mrb[4].mxu0 %vm285_vm0, %v304_v21  ;;  %1064 = vmatmul.mubr.msk.bf16.vlgmr.msra.gmra.mrb[4].mxu1 %vm285_vm0, %v305_v22 }
  0x23   : > { %1069 = vmatprep.mubr.msk.bf16.mxu0 %vm1170_vm1, %v1169_v0  ;;  %1075 = vmatprep.mubr.msk.bf16.mxu1 %vm1170_vm1, %v1169_v0 }
  0x24   : > { %1068 = vmatpush3.bf16.msra.mxu0 %v629_v62  ;;  %1074 = vmatpush3.bf16.msra.mxu1 %v675_v1 }
  0x25   : > { %1079 = vmatprep.subr.bf16.mxu0 %v1169_v0  ;;  %1085 = vmatprep.subr.bf16.mxu1 %v1169_v0 }
  0xed   : > { %v1267_v24 = vpop.f32.mrb[0].mxu0  ;;  %v1269_v25 = vpop.f32.mrb[0].mxu1 }
  0xee   : > { %v1047_v26 = vpop.f32.mrb[1].mxu0  ;;  %v503_v27 = vsel %vm285_vm0, %v1267_v24, -inf  ;;  %v1053_v28 = vpop.f32.mrb[1].mxu1  ;;  %v506_v33 = vsel %vm285_vm0, %v1269_v25, -inf }
  0xef   : > { %504 = vmax.xlane.f32.xlu0 %v503_v27  ;;  %v358_v29 = vpop.f32.mrb[2].mxu0  ;;  %v404_v30 = vpop.f32.mrb[2].mxu1 }
  0xf0   : > { %v1048_v31 = vpop.f32.mrb[3].mxu0  ;;  %v1054_v32 = vpop.f32.mrb[3].mxu1 }
  0xf3   : > { %507 = vmax.xlane.f32.xlu0 %v506_v33 }
  0xf5   : > { %v1275_v34 = vpop.f32.mrb[4].mxu0  ;;  %v1277_v35 = vpop.f32.mrb[4].mxu1 }
  0xf6   : > { %v1059_v36 = vpop.f32.mrb[5].mxu0  ;;  %v509_v37 = vsel %vm285_vm0, %v1275_v34, -inf  ;;  %v1065_v38 = vpop.f32.mrb[5].mxu1  ;;  %v512_v43 = vsel %vm285_vm0, %v1277_v35, -inf }
  0xf7   : > { %510 = vmax.xlane.f32.xlu1 %v509_v37  ;;  %v450_v39 = vpop.f32.mrb[6].mxu0  ;;  %v496_v40 = vpop.f32.mrb[6].mxu1  ;;  %v563_v37 = vld [vmem:[#allocation3] sm:$0xff] }
  0xf8   : > { %v1060_v41 = vpop.f32.mrb[7].mxu0  ;;  %v1066_v42 = vpop.f32.mrb[7].mxu1  ;;  %v564_v40 = vld [vmem:[#allocation3 + $0x8] sm:$0xff] }
  0xfb   : > { %513 = vmax.xlane.f32.xlu1 %v512_v43 }
 0x17c   : > { %v505_v46 = vpop.xlane.xlu0 %504 }
 0x17d   : > { %v1286_v47 = vmax.f32 %v1283_v45, %v505_v46 }
 0x17f   : > { %v519_v49 = vsub.f32 %v1283_v45, %v1286_v47  ;;  %817 = vst.msk [vmem:[#allocation2] sm:$0xff] %vm276_vm2, %v1286_v47  ;;  %533 = vperm.xlu0 %1119, %v1286_v47  }
 0x180   : > { %v508_v50 = vpop.xlane.xlu0 %507 }
 0x181   : > { %v1296_v51 = vmax.f32 %v1288_v48, %v508_v50 }
 0x183   : > { %v520_v53 = vsub.f32 %v1288_v48, %v1296_v51  ;;  %818 = vst.msk [vmem:[#allocation2 + $0x8] sm:$0xff] %vm276_vm2, %v1296_v51  ;;  %538 = vperm.xlu1 %1120, %v1296_v51   ;;  %v566_v48 = vld [vmem:[#allocation3 + $0x18] sm:$0xff] }
 0x184   : > { %v511_v54 = vpop.xlane.xlu1 %510 }
 0x185   : > { %v1306_v55 = vmax.f32 %v1298_v52, %v511_v54  ;;  %v525_v28 = vmul.f32 1.442695, %v520_v53 }
 0x187   : > { %v521_v57 = vsub.f32 %v1298_v52, %v1306_v55  ;;  %819 = vst.msk [vmem:[#allocation2 + $0x10] sm:$0xff] %vm276_vm2, %v1306_v55  ;;  %543 = vperm.xlu1 %1120, %v1306_v55  }
 0x188   : > { %v514_v58 = vpop.xlane.xlu1 %513 }
 0x189   : > { %v1316_v59 = vmax.f32 %v1308_v56, %v514_v58  ;;  %v527_v31 = vmul.f32 1.442695, %v521_v57  ;;  %v592_v57 = vld [vmem:[#allocation4] sm:$0xff] }
 0x18b   : > { %v522_v60 = vsub.f32 %v1308_v56, %v1316_v59  ;;  %820 = vst.msk [vmem:[#allocation2 + $0x18] sm:$0xff] %vm276_vm2, %v1316_v59  ;;  %548 = vperm.xlu1 %1120, %v1316_v59  }
 0x18d   : > { %v529_v32 = vmul.f32 1.442695, %v522_v60  ;;  %v593_v60 = vld [vmem:[#allocation4 + $0x8] sm:$0xff] }
 0x1fe   : > { %v534_v6 = vpop.permute.xlu0 %533 }
 0x1ff   : > { %v551_v7 = vsub.f32 %v1267_v24, %v534_v6  ;;  %v594_v6 = vld [vmem:[#allocation4 + $0x10] sm:$0xff] }
 0x201   : > { %v555_v8 = vmul.f32 1.442695, %v551_v7 }
 0x202   : > { %v539_v9 = vpop.permute.xlu1 %538 }
 0x203   : > { %1121 = vpow2.f32 %v555_v8  ;;  %v552_v10 = vsub.f32 %v1269_v25, %v539_v9 }
 0x205   : > { %v557_v11 = vmul.f32 1.442695, %v552_v10 }
 0x206   : > { %v544_v12 = vpop.permute.xlu1 %543 }
 0x207   : > { %1123 = vpow2.f32 %v557_v11  ;;  %v553_v13 = vsub.f32 %v1275_v34, %v544_v12 }
 0x209   : > { %v559_v14 = vmul.f32 1.442695, %v553_v13  ;;  %v595_v13 = vld [vmem:[#allocation4 + $0x18] sm:$0xff] }
 0x20a   : > { %v549_v15 = vpop.permute.xlu1 %548 }
 0x20b   : > { %1125 = vpow2.f32 %v559_v14  ;;  %v554_v16 = vsub.f32 %v1277_v35, %v549_v15 }
 0x20d   : > { %v1122_v17 = vpop.eup %1121  ;;  %v561_v18 = vmul.f32 1.442695, %v554_v16 }
 0x20e   : > { %v571_v19 = vsel %vm285_vm0, %v1122_v17, 0.0  ;;  %v620_v20 = vpack.c.bf16 %v1122_v17, %v1122_v17 }
 0x20f   : > { %1127 = vpow2.f32 %v561_v18  ;;  %572 = vadd.xlane.f32.xlu1 %v571_v19 }
 0x210   : > { %1070 = vmatmul.mubr.msk.bf16.vlgmr.msra.gmra.mrb[8].mxu0 %vm285_vm0, %v620_v20  ;;  %1129 = vpow2.f32 %v525_v28 }
 0x211   : > { %v1124_v21 = vpop.eup %1123  ;;  %1080 = vmatpush3.bf16.msra.mxu0 %v721_v3  ;;  %1081 = vmatprep.mubr.msk.bf16.mxu0 %vm1170_vm1, %v1169_v0 }
 0x212   : > { %v574_v22 = vsel %vm285_vm0, %v1124_v21, 0.0  ;;  %v621_v23 = vpack.c.bf16 %v1124_v21, %v1124_v21 }
 0x213   : > { %575 = vadd.xlane.f32.xlu0 %v574_v22 }
 0x214   : > { %1076 = vmatmul.mubr.msk.bf16.vlgmr.msra.gmra.mrb[8].mxu1 %vm285_vm0, %v621_v23 }
 0x215   : > { %v1126_v24 = vpop.eup %1125  ;;  %1086 = vmatpush3.bf16.msra.mxu1 %v767_v5  ;;  %1087 = vmatprep.mubr.msk.bf16.mxu1 %vm1170_vm1, %v1169_v0  ;;  %v523_v0 = vmul.f32 1.442695, %v519_v49 }
 0x216   : > { %v577_v25 = vsel %vm285_vm0, %v1126_v24, 0.0  ;;  %v622_v26 = vpack.c.bf16 %v1126_v24, %v1126_v24 }
 0x217   : > { %578 = vadd.xlane.f32.xlu1 %v577_v25  ;;  %1131 = vpow2.f32 %v523_v0 }
 0x218   : > { %1082 = vmatmul.mubr.msk.bf16.vlgmr.msra.gmra.mrb[12].mxu0 %vm285_vm0, %v622_v26  ;;  %1133 = vpow2.f32 %v527_v31 }
 0x219   : > { %v1128_v27 = vpop.eup %1127  ;;  %1135 = vpow2.f32 %v529_v32 }
 0x21a   : > { %v580_v29 = vsel %vm285_vm0, %v1128_v27, 0.0  ;;  %v623_v30 = vpack.c.bf16 %v1128_v27, %v1128_v27  ;;  %v1130_v33 = vpop.eup %1129 }
 0x21b   : > { %581 = vadd.xlane.f32.xlu1 %v580_v29  ;;  %v568_v42 = vmul.f32 %v1130_v33, %v564_v40 }
 0x21c   : > { %1088 = vmatmul.mubr.msk.bf16.vlgmr.msra.gmra.mrb[12].mxu1 %vm285_vm0, %v623_v30 }
 0x221   : > { %v1132_v34 = vpop.eup %1131 }
 0x222   : > { %v1134_v35 = vpop.eup %1133  ;;  %v567_v38 = vmul.f32 %v1132_v34, %v563_v37 }
 0x223   : > { %v1136_v36 = vpop.eup %1135  ;;  %v569_v46 = vmul.f32 %v1134_v35, %v565_v44 }
 0x224   : > { %v570_v51 = vmul.f32 %v1136_v36, %v566_v48 }
 0x229   : > { %603 = vperm.xlu0 %1119, %v1130_v33  }
 0x22c   : > { %598 = vperm.xlu1 %1120, %v1132_v34  }
 0x230   : > { %608 = vperm.xlu1 %1120, %v1134_v35  }
 0x234   : > { %613 = vperm.xlu1 %1120, %v1136_v36  }
 0x29c   : > { %v573_v39 = vpop.xlane.xlu1 %572 }
 0x29d   : > { %v583_v41 = vadd.f32 %v573_v39, %v567_v38 }
 0x29f   : > { %588 = vst.msk [vmem:[#allocation3] sm:$0xff] %vm276_vm2, %v583_v41 }
 0x2a0   : > { %v576_v43 = vpop.xlane.xlu0 %575 }
 0x2a1   : > { %v584_v45 = vadd.f32 %v576_v43, %v568_v42 }
 0x2a3   : > { %589 = vst.msk [vmem:[#allocation3 + $0x8] sm:$0xff] %vm276_vm2, %v584_v45 }
 0x2a4   : > { %v579_v47 = vpop.xlane.xlu1 %578 }
 0x2a5   : > { %v585_v49 = vadd.f32 %v579_v47, %v569_v46 }
 0x2a6   : > { %v828_v50 = vld [vmem:[#allocation3] sm:$0xff] }
 0x2a7   : > { %590 = vst.msk [vmem:[#allocation3 + $0x10] sm:$0xff] %vm276_vm2, %v585_v49  ;;  %834 = vperm.xlu1 %1120, %v828_v50  }
 0x2a8   : > { %v582_v52 = vpop.xlane.xlu1 %581  ;;  %v604_v61 = vpop.permute.xlu0 %603 }
 0x2a9   : > { %v586_v53 = vadd.f32 %v582_v52, %v570_v51  ;;  %v617_v4 = vmul.f32 %v604_v61, %v593_v60 }
 0x2aa   : > { %v829_v54 = vld [vmem:[#allocation3 + $0x8] sm:$0xff] }
 0x2ab   : > { %591 = vst.msk [vmem:[#allocation3 + $0x18] sm:$0xff] %vm276_vm2, %v586_v53  ;;  %839 = vperm.xlu0 %1119, %v829_v54  }
 0x2ac   : > { %v599_v58 = vpop.permute.xlu1 %598 }
 0x2ad   : > { %v616_v59 = vmul.f32 %v599_v58, %v592_v57 }
 0x2ae   : > { %v830_v55 = vld [vmem:[#allocation3 + $0x10] sm:$0xff] }
 0x2af   : > { %844 = vperm.xlu1 %1120, %v830_v55  }
 0x2b0   : > { %v609_v2 = vpop.permute.xlu1 %608 }
 0x2b1   : > { %v618_v11 = vmul.f32 %v609_v2, %v594_v6 }
 0x2b2   : > { %v831_v56 = vld [vmem:[#allocation3 + $0x18] sm:$0xff] }
 0x2b3   : > { %849 = vperm.xlu0 %1119, %v831_v56  }
 0x2b4   : > { %v614_v14 = vpop.permute.xlu1 %613 }
 0x2b5   : > { %v619_v19 = vmul.f32 %v614_v14, %v595_v13 }
 0x2e3   : > { %v665_v62 = vpop.f32.mrb[8].mxu0 }
 0x2e4   : > { %v809_v63 = vadd.f32 %v665_v62, %v616_v59  ;;  %v1071_v1 = vpop.f32.mrb[9].mxu0 }
 0x2e5   : > { %v668_v3 = vpop.f32.mrb[10].mxu0 }
 0x2e6   : > { %813 = vst.msk [vmem:[#allocation4] sm:$0xff] %vm285_vm0, %v809_v63  ;;  %v1072_v5 = vpop.f32.mrb[11].mxu0 }
 0x2e7   : > { %v711_v7 = vpop.f32.mrb[8].mxu1 }
 0x2e8   : > { %v810_v8 = vadd.f32 %v711_v7, %v617_v4  ;;  %v1077_v9 = vpop.f32.mrb[9].mxu1 }
 0x2e9   : > { %v714_v10 = vpop.f32.mrb[10].mxu1 }
 0x2ea   : > { %814 = vst.msk [vmem:[#allocation4 + $0x8] sm:$0xff] %vm285_vm0, %v810_v8  ;;  %v1078_v12 = vpop.f32.mrb[11].mxu1 }
 0x2eb   : > { %v757_v15 = vpop.f32.mrb[12].mxu0 }
 0x2ec   : > { %v811_v16 = vadd.f32 %v757_v15, %v618_v11  ;;  %v1083_v17 = vpop.f32.mrb[13].mxu0 }
 0x2ed   : > { %v760_v18 = vpop.f32.mrb[14].mxu0  ;;  %v824_v30 = vld [vmem:[#allocation4] sm:$0xff] }
 0x2ee   : > { %815 = vst.msk [vmem:[#allocation4 + $0x10] sm:$0xff] %vm285_vm0, %v811_v16  ;;  %v1084_v20 = vpop.f32.mrb[15].mxu0 }
 0x2ef   : > { %v803_v21 = vpop.f32.mrb[12].mxu1 }
 0x2f0   : > { %v812_v22 = vadd.f32 %v803_v21, %v619_v19  ;;  %v1089_v23 = vpop.f32.mrb[13].mxu1 }
 0x2f1   : > { %v806_v24 = vpop.f32.mrb[14].mxu1  ;;  %v825_v34 = vld [vmem:[#allocation4 + $0x8] sm:$0xff] }
 0x2f2   : > { %816 = vst.msk [vmem:[#allocation4 + $0x18] sm:$0xff] %vm285_vm0, %v812_v22  ;;  %v1090_v25 = vpop.f32.mrb[15].mxu1 }
 0x2f5   : > { %v826_v38 = vld [vmem:[#allocation4 + $0x10] sm:$0xff] }
 0x2f9   : > { %v827_v42 = vld [vmem:[#allocation4 + $0x18] sm:$0xff] }
 0x326   : > { %v835_v26 = vpop.permute.xlu1 %834 }
 0x327   : > { %1137 = vrcp.f32 %v835_v26 }
 0x32a   : > { %v840_v27 = vpop.permute.xlu0 %839 }
 0x32b   : > { %1139 = vrcp.f32 %v840_v27 }
 0x32e   : > { %v845_v28 = vpop.permute.xlu1 %844 }
 0x32f   : > { %1141 = vrcp.f32 %v845_v28 }
 0x331   : > { %v1138_v29 = vpop.eup %1137 }
 0x332   : > { %v853_v0 = vmul.f32 %v1138_v29, %v824_v30  ;;  %v850_v31 = vpop.permute.xlu0 %849 }
 0x333   : > { %1143 = vrcp.f32 %v850_v31 }
 0x334   : > { %v860_v32 = vpack.c.bf16 %v853_v0, %v853_v0 }
 0x335   : > { %v1140_v33 = vpop.eup %1139 }
 0x336   : > { %865 = vst.msk [vmem:[%s270_s28] sm:$0xf] %vm864_vm4, %v860_v32  ;;  %v855_v35 = vmul.f32 %v1140_v33, %v825_v34 }
 0x338   : > { %v861_v36 = vpack.c.bf16 %v855_v35, %v855_v35 }
 0x339   : > { %v1142_v37 = vpop.eup %1141 }
 0x33a   : > { %866 = vst.msk [vmem:[%s270_s28 + $0x4] sm:$0xf] %vm864_vm4, %v861_v36  ;;  %v857_v39 = vmul.f32 %v1142_v37, %v826_v38 }
 0x33c   : > { %v862_v40 = vpack.c.bf16 %v857_v39, %v857_v39 }
 0x33d   : > { %v1144_v41 = vpop.eup %1143 }
 0x33e   : > { %867 = vst.msk [vmem:[%s270_s28 + $0x8] sm:$0xf] %vm864_vm4, %v862_v40  ;;  %v859_v43 = vmul.f32 %v1144_v41, %v827_v42 }
 0x340   : > { %v863_v44 = vpack.c.bf16 %v859_v43, %v859_v43 }
 0x342   : > { %868 = vst.msk [vmem:[%s270_s28 + $0xc] sm:$0xf] %vm864_vm4, %v863_v44 }
 0x343 PF: > { %s13_s14 = sadd.s32 1, %s1167_s14   ;;  %s1383_s12 = smov %s1163_s13 }
 0x344   : > { %p10_p5 = scmp.ge.s32.totalorder %s13_s14, 4   ;;  %s1384_s13 = smov %s1386_s15 }
 0x346   :  { %12 = sbr.rel (!%p10_p5) target bundleno = 2 (0x2), region = 76 }

</bundles_post_ra>
